<compile_context>
chip_gen: v7x
topology: tpu7x:2x2x1
jax: 0.10.0
libtpu: 0.0.40
codegen_flags: <defaults>
</compile_context>

<pallas_src>
import math

import jax
import jax.numpy as jnp
from jax import lax
from jax.experimental import pallas as pl
from jax.experimental.pallas import tpu as pltpu

_LANE = 128


def _round_up(v, m):
    return ((v + m - 1) // m) * m


def _ginet_conv_kernel(xw_ref, col_c_ref, row_r_ref, z_ref):
    """One edge block per grid step; z_ref is the resident [N_pad, C_pad] accumulator."""
    e_blk = pl.program_id(0)

    @pl.when(e_blk == 0)
    def _():
        z_ref[...] = jnp.zeros_like(z_ref)

    tE = col_c_ref.shape[0]
    n_pad = xw_ref.shape[0]
    dtype = xw_ref.dtype

    # One-hot matrices, built directly in the orientation each matmul needs so every
    # contraction runs over the lane axis (no XLU transpose of an [E, N] tile).  0/1 are
    # exact in bf16, so low-precision operands only round the gathered node features.
    # Note: the iota build is cheap VPU filler (the kernel is MXU-bound), so it is not
    # hoisted into a per-kernel scratch.
    iota_en = lax.broadcasted_iota(jnp.int32, (tE, n_pad), 1)
    onehot_col_en = jnp.where(iota_en == col_c_ref[...], 1.0, 0.0).astype(dtype)  # [tE, N_pad]
    iota_ne = lax.broadcasted_iota(jnp.int32, (n_pad, tE), 0)
    onehot_row_ne = jnp.where(iota_ne == row_r_ref[...], 1.0, 0.0).astype(dtype)  # [N_pad, tE]

    # h = alpha * xw[col] with alpha == softmax over a width-1 axis == exactly 1.0, so the
    # attention branch is dropped (bit-exact).  Gather xw[col] on the MXU: a single 1.0 per
    # one-hot row, padded edges have index -1 and therefore an all-zero row.
    xcol = jnp.dot(onehot_col_en, xw_ref[...],
                   preferred_element_type=jnp.float32)                            # [tE, C_pad]

    # scatter_sum(h, row, dim=0) == onehot_row^T @ h (one-hot built pre-transposed).
    # Casting xcol back to `dtype` is lossless: its entries are exactly rows of xw_ref.
    z_ref[...] += jnp.dot(onehot_row_ne, xcol.astype(dtype),
                          preferred_element_type=jnp.float32)


def ginet_conv_layer(x, edge_index, edge_attr, w_fc, w_edge, w_att, *,
                     edge_block=256, compute_dtype=jnp.bfloat16, vmem_limit_mb=56):
    """x: [N, C_in] f32; edge_index: [2, E] int; edge_attr: [E] or [E, F] f32.
    w_fc: [C_out, C_in]; w_edge: [F, F]; w_att: [1, 2*C_out + F] (torch Linear weights).

    edge_attr / w_edge / w_att are accepted for API parity with the torch module but have
    no effect on the output: softmax over the width-1 attention axis is exactly 1.0."""
    del edge_attr, w_edge, w_att  # mathematically dead (see docstring)

    x = x.astype(jnp.float32)
    N, C_in = x.shape
    C_out = w_fc.shape[0]
    E = edge_index.shape[1]

    # Lane-dense padding of the feature dim; node dim padded to a lane multiple so the
    # gather-matmul contraction (K = N_pad) is lane-aligned.
    C_pad = _round_up(max(C_out, 1), _LANE)
    N_pad = _round_up(max(N, 1), _LANE)
    tE = _round_up(max(edge_block, 1), _LANE)
    E_pad = _round_up(max(E, 1), tE)

    # Node linear hoisted out of the kernel (plain XLA matmul, tiled optimally by XLA);
    # zero padding keeps all kernel math exact.
    xw = x @ w_fc.astype(jnp.float32).T                               # [N, C_out] f32
    xw_p = jnp.zeros((N_pad, C_pad), compute_dtype).at[:N, :C_out].set(
        xw.astype(compute_dtype))

    # Edge indices: padded edges get index -1 (never matches a node => zero one-hot).
    row = edge_index[0].astype(jnp.int32)
    col = edge_index[1].astype(jnp.int32)
    row_p = jnp.full((E_pad,), -1, jnp.int32).at[:E].set(row)
    col_p = jnp.full((E_pad,), -1, jnp.int32).at[:E].set(col)
    col_c = col_p[:, None]            # [E_pad, 1]  gather orientation
    row_r = row_p[None, :]            # [1, E_pad]  scatter orientation

    n_eblk = E_pad // tE
    itemsize = jnp.dtype(compute_dtype).itemsize
    flops = 4 * E_pad * N_pad * C_pad
    bytes_accessed = (itemsize * N_pad * C_pad          # resident xw
                      + 4 * 2 * E_pad                   # edge indices
                      + 4 * N_pad * C_pad)              # z writeback

    z_full = pl.pallas_call(
        _ginet_conv_kernel,
        out_shape=jax.ShapeDtypeStruct((N_pad, C_pad), jnp.float32),
        grid_spec=pltpu.PrefetchScalarGridSpec(
            num_scalar_prefetch=0,
            grid=(n_eblk,),
            in_specs=[
                # xw is block-invariant: keep it resident and single-buffered.
                pl.BlockSpec((N_pad, C_pad), lambda e: (0, 0),
                             pipeline_mode=pl.Buffered(1)),
                pl.BlockSpec((tE, 1), lambda e: (e, 0)),     # col (gather orientation)
                pl.BlockSpec((1, tE), lambda e: (0, e)),     # row (scatter orientation)
            ],
            out_specs=pl.BlockSpec((N_pad, C_pad), lambda e: (0, 0)),
        ),
        compiler_params=pltpu.CompilerParams(
            dimension_semantics=("arbitrary",),      # z accumulated across the edge axis
            vmem_limit_bytes=int(vmem_limit_mb) * 1024 * 1024,
        ),
        cost_estimate=pl.CostEstimate(
            flops=int(flops), transcendentals=0, bytes_accessed=int(bytes_accessed)),
    )(xw_p, col_c, row_r)

    return z_full[:N, :C_out]


if __name__ == "__main__":
    key = jax.random.PRNGKey(0)
    N, C_in, C_out, F_, E = 16, 8, 8, 1, 32
    k1, k2, k3, k4, k5, k6, k7 = jax.random.split(key, 7)

    x = jax.random.normal(k1, (N, C_in), jnp.float32)
    row = jax.random.randint(k2, (E,), 0, N, jnp.int32)
    col = jax.random.randint(k3, (E,), 0, N, jnp.int32)
    edge_index = jnp.stack([row, col])
    edge_attr = jax.random.normal(k4, (E,), jnp.float32)   # 1-D, module unsqueezes

    # deterministic init matching reset_parameters(): uniform(-1/sqrt(in), +1/sqrt(in))
    bound = 1.0 / math.sqrt(C_in)
    w_fc = jax.random.uniform(k5, (C_out, C_in), jnp.float32, -bound, bound)
    w_edge = jax.random.uniform(k6, (F_, F_), jnp.float32, -bound, bound)
    w_att = jax.random.uniform(k7, (1, 2 * C_out + F_), jnp.float32, -bound, bound)

    # pure-JAX reference of the torch forward pass (attention branch kept literal here).
    ea = edge_attr[:, None]
    xw_ref_mat = x @ w_fc.T
    xrow_r, xcol_r = xw_ref_mat[row], xw_ref_mat[col]
    ed_r = ea @ w_edge.T
    a = jnp.concatenate([xrow_r, xcol_r, ed_r], axis=1) @ w_att.T
    a = jnp.where(a >= 0, a, 0.01 * a)
    a = jax.nn.softmax(a, axis=1)
    h = a * xcol_r
    z_ref = jnp.zeros((N, C_out), jnp.float32).at[row].add(h)

    # f32 path: structurally exact vs. the reference (tolerance covers sum-order rounding).
    z_f32 = ginet_conv_layer(x, edge_index, edge_attr, w_fc, w_edge, w_att,
                             compute_dtype=jnp.float32)
    z_f32 = jax.block_until_ready(z_f32)
    assert z_f32.shape == (N, C_out)
    assert jnp.allclose(z_f32, z_ref, rtol=5e-3, atol=5e-3), "f32 mismatch vs reference"

    # bf16 fast path (default): only the gathered node features round to bf16.
    z_bf16 = ginet_conv_layer(x, edge_index, edge_attr, w_fc, w_edge, w_att)
    z_bf16 = jax.block_until_ready(z_bf16)
    assert z_bf16.shape == (N, C_out)
    assert jnp.allclose(z_bf16, z_ref, rtol=3e-2, atol=3e-2), "bf16 mismatch vs reference"

    print("KERNEL_OK")
</pallas_src>

<mosaic_0001>
module attributes {stable_mosaic.version = 11 : i64} {
  func.func @_ginet_conv_kernel(%arg0: i32, %arg1: memref<128x128xf32, #tpu.memory_space<vmem>>, %arg2: memref<256x1xi32, #tpu.memory_space<vmem>>, %arg3: memref<1x256xi32, #tpu.memory_space<vmem>>, %arg4: memref<128x128xf32, #tpu.memory_space<vmem>>) attributes {dimension_semantics = [#tpu.dimension_semantics<arbitrary>], iteration_bounds = array<i64: 1>, scalar_prefetch = 0 : i64, scratch_operands = 0 : i64, tpu.core_type = #tpu.core_type<tc>, window_params = [{pipeline_mode = #tpu.pipeline_mode<synchronous>, transform_indices = @transform_0, window_bounds = array<i64: 128, 128>}, {transform_indices = @transform_1, window_bounds = array<i64: 256, 1>}, {transform_indices = @transform_2, window_bounds = array<i64: 1, 256>}, {pipeline_mode = #tpu.pipeline_mode<synchronous>, transform_indices = @transform_3, window_bounds = array<i64: 128, 128>}]} {
    %c0_i32 = arith.constant 0 : i32
    %0 = arith.cmpi eq, %arg0, %c0_i32 : i32
    %1 = arith.extui %0 : i1 to i32
    %c0_i32_0 = arith.constant 0 : i32
    %2 = arith.cmpi ne, %1, %c0_i32_0 : i32
    scf.if %2 {
      %cst_15 = arith.constant 0.000000e+00 : f32
      %23 = vector.broadcast %cst_15 : f32 to vector<128x128xf32>
      %c0_16 = arith.constant 0 : index
      %c0_17 = arith.constant 0 : index
      %24 = vector.load %arg4[%c0_16, %c0_17] : memref<128x128xf32, #tpu.memory_space<vmem>>, vector<128x128xf32>
      tpu.vector_store %arg4[%c0_16, %c0_17], %23 {strides = array<i32>} : memref<128x128xf32, #tpu.memory_space<vmem>>, vector<128x128xf32>,
    } else {
    }
    %3 = tpu.iota {dimensions = array<i32: 1>} : vector<256x128xi32>
    %c0 = arith.constant 0 : index
    %c0_1 = arith.constant 0 : index
    %4 = vector.load %arg2[%c0, %c0_1] : memref<256x1xi32, #tpu.memory_space<vmem>>, vector<256x1xi32>
    %5 = vector.broadcast %4 : vector<256x1xi32> to vector<256x128xi32>
    %6 = arith.cmpi eq, %3, %5 : vector<256x128xi32>
    %cst = arith.constant 1.000000e+00 : f32
    %cst_2 = arith.constant 0.000000e+00 : f32
    %7 = vector.broadcast %cst : f32 to vector<256x128xf32>
    %8 = vector.broadcast %cst_2 : f32 to vector<256x128xf32>
    %9 = arith.select %6, %7, %8 : vector<256x128xi1>, vector<256x128xf32>
    %10 = tpu.iota {dimensions = array<i32: 0>} : vector<128x256xi32>
    %c0_3 = arith.constant 0 : index
    %c0_4 = arith.constant 0 : index
    %11 = vector.load %arg3[%c0_3, %c0_4] : memref<1x256xi32, #tpu.memory_space<vmem>>, vector<1x256xi32>
    %12 = vector.broadcast %11 : vector<1x256xi32> to vector<128x256xi32>
    %13 = arith.cmpi eq, %10, %12 : vector<128x256xi32>
    %cst_5 = arith.constant 1.000000e+00 : f32
    %cst_6 = arith.constant 0.000000e+00 : f32
    %14 = vector.broadcast %cst_5 : f32 to vector<128x256xf32>
    %15 = vector.broadcast %cst_6 : f32 to vector<128x256xf32>
    %16 = arith.select %13, %14, %15 : vector<128x256xi1>, vector<128x256xf32>
    %c0_7 = arith.constant 0 : index
    %c0_8 = arith.constant 0 : index
    %17 = vector.load %arg1[%c0_7, %c0_8] : memref<128x128xf32, #tpu.memory_space<vmem>>, vector<128x128xf32>
    %cst_9 = arith.constant dense<0.000000e+00> : vector<256x128xf32>
    %18 = tpu.matmul %9, %17, %cst_9 {dimension_numbers = #tpu.dot_dimension_numbers<[1], [0], [0], [1], [0, 0, 1, 1], [], []>} : vector<256x128xf32>, vector<128x128xf32>, vector<256x128xf32> -> vector<256x128xf32>
    %c0_10 = arith.constant 0 : index
    %c0_11 = arith.constant 0 : index
    %19 = vector.load %arg4[%c0_10, %c0_11] : memref<128x128xf32, #tpu.memory_space<vmem>>, vector<128x128xf32>
    %cst_12 = arith.constant dense<0.000000e+00> : vector<128x128xf32>
    %20 = tpu.matmul %16, %18, %cst_12 {dimension_numbers = #tpu.dot_dimension_numbers<[1], [0], [0], [1], [0, 0, 1, 1], [], []>} : vector<128x256xf32>, vector<256x128xf32>, vector<128x128xf32> -> vector<128x128xf32>
    %21 = arith.addf %19, %20 : vector<128x128xf32>
    %c0_13 = arith.constant 0 : index
    %c0_14 = arith.constant 0 : index
    %22 = vector.load %arg4[%c0_13, %c0_14] : memref<128x128xf32, #tpu.memory_space<vmem>>, vector<128x128xf32>
    tpu.vector_store %arg4[%c0_13, %c0_14], %21 {strides = array<i32>} : memref<128x128xf32, #tpu.memory_space<vmem>>, vector<128x128xf32>,
    return
  }
  func.func @transform_0(%arg0: i32) -> (i32, i32) {
    %c0_i32 = arith.constant 0 : i32
    %c0_i32_0 = arith.constant 0 : i32
    %c0_i32_1 = arith.constant 0 : i32
    return %c0_i32, %c0_i32_0 : i32, i32
  }
  func.func @transform_1(%arg0: i32) -> (i32, i32) {
    %c0_i32 = arith.constant 0 : i32
    %c0_i32_0 = arith.constant 0 : i32
    return %arg0, %c0_i32 : i32, i32
  }
  func.func @transform_2(%arg0: i32) -> (i32, i32) {
    %c0_i32 = arith.constant 0 : i32
    %c0_i32_0 = arith.constant 0 : i32
    return %c0_i32, %arg0 : i32, i32
  }
  func.func @transform_3(%arg0: i32) -> (i32, i32) {
    %c0_i32 = arith.constant 0 : i32
    %c0_i32_0 = arith.constant 0 : i32
    %c0_i32_1 = arith.constant 0 : i32
    return %c0_i32, %c0_i32_0 : i32, i32
  }
}

</mosaic_0001>

<bundles_post_ra>
// kernel: tpu_custom_call.1
= control target key start
LH: loop header
LB: loop body
LE: loop exit
PB: predicated region body
PF: predicated region fallthrough
CT: control target
= control target key end

     0   :  { %v1137_v2 = vmov 0   ;;  %s1631_s0 = inlined_call_operand.vmem [shape: f32[128,128], index: 0, kind: input, shape index: {}]   ;;  %s1632_s1 = inlined_call_operand.vmem [shape: s32[256,1], index: 1, kind: input, shape index: {}]   ;;  %s1633_s2 = inlined_call_operand.vmem [shape: s32[1,256], index: 2, kind: input, shape index: {}]   ;;  %s1634_s3 = inlined_call_operand.hbm [shape: f32[128,128], index: 3, kind: output, shape index: {}]  }
   0x1   :  { %v39_v0 = vld [vmem:[%s1632_s1 + $0x10] sm:$0xff]  ;;  %v37_v1 = vld [vmem:[%s1632_s1] sm:$0xff]  ;;  %1112 = vset.pattern.permute.xlu1 %v1137_v2  ;;  %1111 = vset.pattern.permute.xlu0 %v1137_v2  ;;  %v40_v3 = vld [vmem:[%s1632_s1 + $0x18] sm:$0xff] }
   0x2   :  { %76 = vperm.xlu1 %1112, %v39_v0   ;;  %70 = vperm.xlu0 %1111, %v37_v1   ;;  %v38_v4 = vld [vmem:[%s1632_s1 + $0x8] sm:$0xff]  ;;  %v41_v6 = vld [vmem:[%s1632_s1 + $0x20] sm:$0xff]  ;;  %v44_v7 = vld [vmem:[%s1632_s1 + $0x38] sm:$0xff] }
   0x3   :  { %v42_v5 = vld [vmem:[%s1632_s1 + $0x28] sm:$0xff]  ;;  %v43_v8 = vld [vmem:[%s1632_s1 + $0x30] sm:$0xff]  ;;  %v319_v9 = vld [vmem:[%s1631_s0] sm:$0xff] }
   0x4   :  { %v320_v10 = vld [vmem:[%s1631_s0 + $0x8] sm:$0xff]  ;;  %v321_v11 = vld [vmem:[%s1631_s0 + $0x10] sm:$0xff]  ;;  %v322_v12 = vld [vmem:[%s1631_s0 + $0x18] sm:$0xff] }
   0x5   :  { %v1041_v13 = vpack.c.bf16 %v320_v10, %v319_v9  ;;  %v1045_v14 = vpack.c.bf16 %v322_v12, %v321_v11  ;;  %v323_v15 = vld [vmem:[%s1631_s0 + $0x20] sm:$0xff]  ;;  %v324_v16 = vld [vmem:[%s1631_s0 + $0x28] sm:$0xff] }
   0x6   :  { %79 = vperm.xlu1 %1112, %v40_v3   ;;  %73 = vperm.xlu0 %1111, %v38_v4   ;;  %v46_v17 = vld [vmem:[%s1632_s1 + $0x48] sm:$0xff]  ;;  %v45_v18 = vld [vmem:[%s1632_s1 + $0x40] sm:$0xff] }
   0x7   :  { %1042 = vmatprep.subr.bf16.mxu0 %v1041_v13 }
   0x8   :  { %1044 = vmatpush3.bf16.msra.mxu0 %v1041_v13 }
   0xa   :  { %85 = vperm.xlu1 %1112, %v42_v5   ;;  %82 = vperm.xlu0 %1111, %v41_v6  }
   0xe   :  { %91 = vperm.xlu1 %1112, %v44_v7   ;;  %88 = vperm.xlu0 %1111, %v43_v8  }
   0xf   :  { %8 = vsyncpa [#allocation3], 0  ;;  %1046 = vmatprep.subr.bf16.mxu0 %v1045_v14  ;;  %v1049_v19 = vpack.c.bf16 %v324_v16, %v323_v15  ;;  %v325_v20 = vld [vmem:[%s1631_s0 + $0x30] sm:$0xff]  ;;  %v326_v21 = vld [vmem:[%s1631_s0 + $0x38] sm:$0xff]  ;;  %v35_v57 = vlaneseq  ;;  %v1138_v61 = vmov 1.0  }
  0x10   :  { %v48_v22 = vld [vmem:[%s1632_s1 + $0x58] sm:$0xff]  ;;  %v47_v23 = vld [vmem:[%s1632_s1 + $0x50] sm:$0xff]  ;;  %1048 = vmatpush3.bf16.msra.mxu0 %v1045_v14  ;;  %v1053_v24 = vpack.c.bf16 %v326_v21, %v325_v20  ;;  %v327_v25 = vld [vmem:[%s1631_s0 + $0x40] sm:$0xff] }
  0x11   :  { %1050 = vmatprep.subr.bf16.mxu0 %v1049_v19  ;;  %v328_v26 = vld [vmem:[%s1631_s0 + $0x48] sm:$0xff]  ;;  %v49_v28 = vld [vmem:[%s1632_s1 + $0x60] sm:$0xff]  ;;  %v329_v30 = vld [vmem:[%s1631_s0 + $0x50] sm:$0xff]  ;;  %v1307_v58 = vand.u32 127, %v35_v57 }
  0x12   :  { %97 = vperm.xlu1 %1112, %v46_v17   ;;  %94 = vperm.xlu0 %1111, %v45_v18   ;;  %v50_v27 = vld [vmem:[%s1632_s1 + $0x68] sm:$0xff]  ;;  %v1057_v29 = vpack.c.bf16 %v328_v26, %v327_v25  ;;  %v330_v31 = vld [vmem:[%s1631_s0 + $0x58] sm:$0xff]  ;;  %v51_v33 = vld [vmem:[%s1632_s1 + $0x70] sm:$0xff] }
  0x13   :  { %v52_v32 = vld [vmem:[%s1632_s1 + $0x78] sm:$0xff]  ;;  %v1061_v34 = vpack.c.bf16 %v330_v31, %v329_v30  ;;  %v331_v35 = vld [vmem:[%s1631_s0 + $0x60] sm:$0xff]  ;;  %v332_v36 = vld [vmem:[%s1631_s0 + $0x68] sm:$0xff] }
  0x14   :  { %1052 = vmatpush3.bf16.msra.mxu0 %v1049_v19  ;;  %v54_v37 = vld [vmem:[%s1632_s1 + $0x88] sm:$0xff]  ;;  %v53_v38 = vld [vmem:[%s1632_s1 + $0x80] sm:$0xff]  ;;  %v1065_v39 = vpack.c.bf16 %v332_v36, %v331_v35  ;;  %v333_v40 = vld [vmem:[%s1631_s0 + $0x70] sm:$0xff] }
  0x15   :  { %1054 = vmatprep.subr.bf16.mxu0 %v1053_v24  ;;  %v334_v41 = vld [vmem:[%s1631_s0 + $0x78] sm:$0xff]  ;;  %v55_v43 = vld [vmem:[%s1632_s1 + $0x90] sm:$0xff]  ;;  %v58_v45 = vld [vmem:[%s1632_s1 + $0xa8] sm:$0xff] }
  0x16   :  { %103 = vperm.xlu1 %1112, %v48_v22   ;;  %100 = vperm.xlu0 %1111, %v47_v23   ;;  %v56_v42 = vld [vmem:[%s1632_s1 + $0x98] sm:$0xff]  ;;  %v1069_v44 = vpack.c.bf16 %v334_v41, %v333_v40  ;;  %v57_v46 = vld [vmem:[%s1632_s1 + $0xa0] sm:$0xff]  ;;  %v59_v48 = vld [vmem:[%s1632_s1 + $0xb0] sm:$0xff] }
  0x17   :  { %v60_v47 = vld [vmem:[%s1632_s1 + $0xb8] sm:$0xff]  ;;  %v62_v49 = vld [vmem:[%s1632_s1 + $0xc8] sm:$0xff]  ;;  %v61_v50 = vld [vmem:[%s1632_s1 + $0xc0] sm:$0xff] }
  0x18   :  { %1056 = vmatpush3.bf16.msra.mxu0 %v1053_v24  ;;  %v64_v51 = vld [vmem:[%s1632_s1 + $0xd8] sm:$0xff]  ;;  %v63_v52 = vld [vmem:[%s1632_s1 + $0xd0] sm:$0xff]  ;;  %v66_v53 = vld [vmem:[%s1632_s1 + $0xe8] sm:$0xff] }
  0x19   :  { %1058 = vmatprep.subr.bf16.mxu0 %v1057_v29  ;;  %v65_v54 = vld [vmem:[%s1632_s1 + $0xe0] sm:$0xff]  ;;  %v68_v55 = vld [vmem:[%s1632_s1 + $0xf8] sm:$0xff]  ;;  %v67_v56 = vld [vmem:[%s1632_s1 + $0xf0] sm:$0xff] }
  0x1a   :  { %109 = vperm.xlu1 %1112, %v50_v27   ;;  %106 = vperm.xlu0 %1111, %v49_v28   ;;  %v1374_v28 = vshrl.u32 %v35_v57, 7  ;;  %v246_v30 = vld [vmem:[%s1633_s2] sm:$0x3]  ;;  %s1139_s2 = smov [#allocation2]  }
  0x1b   :  { %s758_s27 = sshll.u32 %s1139_s2, 4  ;;  %s759_s27 = int_to_ptr.vmem [resolvable:$true] %s758_s27 }
  0x1c   :  { %1060 = vmatpush3.bf16.msra.mxu0 %v1057_v29  ;;  %v253_v29 = vsub.s32 1, %v1374_v28  ;;  %v249_v31 = vsub.s32 0, %v1374_v28  ;;  %v1398_v35 = vadd.s32 16, %v1374_v28  ;;  %v1405_v36 = vadd.s32 24, %v1374_v28  ;;  %s1113_s28 = scalar_lea.vmem %s759_s27, 2048  ;;  %p1118_p1 = scmp.lt.s32.totalorder %s759_s27, %s759_s27 }
  0x1d   :  { %1062 = vmatprep.subr.bf16.mxu0 %v1061_v34  ;;  %v1433_v40 = vadd.s32 56, %v1374_v28  ;;  %v1440_v41 = vadd.s32 64, %v1374_v28  ;;  %p1114_p0 = scmp.ne.s32.totalorder %s759_s27, %s1113_s28  ;;  %p1119_p2 = scmp.lt.s32.totalorder %s1113_s28, %s1113_s28 }
  0x1e   :  { %115 = vperm.xlu1 %1112, %v52_v32   ;;  %112 = vperm.xlu0 %1111, %v51_v33   ;;  %v1381_v32 = vrot.slane %v246_v30, %v253_v29  ;;  %v1383_v33 = vrot.slane %v246_v30, %v249_v31 }
  0x1f   :  { %p1120_p3 = por %p1119_p2, %p1118_p1 }
  0x20   :  { %1064 = vmatpush3.bf16.msra.mxu0 %v1061_v34  ;;  %v1391_v34 = vadd.s32 8, %v1374_v28 }
  0x21   :  { %1066 = vmatprep.subr.bf16.mxu0 %v1065_v39  ;;  %p1121_p4 = pnand %p1120_p3, %p1114_p0 }
  0x22   :  { %121 = vperm.xlu1 %1112, %v54_v37   ;;  %118 = vperm.xlu0 %1111, %v53_v38   ;;  %v1412_v37 = vadd.s32 32, %v1374_v28  ;;  %v1419_v38 = vadd.s32 40, %v1374_v28 }
  0x24   :  { %1068 = vmatpush3.bf16.msra.mxu0 %v1065_v39  ;;  %v1426_v39 = vadd.s32 48, %v1374_v28 }
  0x25   :  { %1070 = vmatprep.subr.bf16.mxu0 %v1069_v44 }
  0x26   :  { %127 = vperm.xlu1 %1112, %v56_v42   ;;  %124 = vperm.xlu0 %1111, %v55_v43   ;;  %v1447_v42 = vadd.s32 72, %v1374_v28  ;;  %v1454_v43 = vadd.s32 80, %v1374_v28 }
  0x28   :  { %1072 = vmatpush3.bf16.msra.mxu0 %v1069_v44  ;;  %v1461_v44 = vadd.s32 88, %v1374_v28 }
  0x2a   :  { %133 = vperm.xlu1 %1112, %v58_v45   ;;  %130 = vperm.xlu0 %1111, %v57_v46   ;;  %v1468_v45 = vadd.s32 96, %v1374_v28  ;;  %v1475_v46 = vadd.s32 104, %v1374_v28 }
  0x2e   :  { %139 = vperm.xlu1 %1112, %v60_v47   ;;  %136 = vperm.xlu0 %1111, %v59_v48   ;;  %v1482_v47 = vadd.s32 112, %v1374_v28  ;;  %v1489_v48 = vadd.s32 120, %v1374_v28 }
  0x32   :  { %145 = vperm.xlu1 %1112, %v62_v49   ;;  %142 = vperm.xlu0 %1111, %v61_v50  }
  0x36   :  { %151 = vperm.xlu1 %1112, %v64_v51   ;;  %148 = vperm.xlu0 %1111, %v63_v52  }
  0x3a   :  { %157 = vperm.xlu1 %1112, %v66_v53   ;;  %154 = vperm.xlu0 %1111, %v65_v54  }
  0x3e   :  { %163 = vperm.xlu1 %1112, %v68_v55   ;;  %160 = vperm.xlu0 %1111, %v67_v56  }
  0x81   :  { %v77_v59 = vpop.permute.xlu1 %76  ;;  %v71_v60 = vpop.permute.xlu0 %70 }
  0x82   :  { %vm165_vm0 = vcmp.eq.s32.totalorder %v1307_v58, %v71_v60  ;;  %vm167_vm1 = vcmp.eq.s32.totalorder %v1307_v58, %v77_v59 }
  0x83   :  { %993 = vmatprep.mubr.msk.f32.mxu0 %vm165_vm0, %v1138_v61 }
  0x85   :  { %v80_v62 = vpop.permute.xlu1 %79  ;;  %v74_v63 = vpop.permute.xlu0 %73 }
  0x86   :  { %vm166_vm2 = vcmp.eq.s32.totalorder %v1307_v58, %v74_v63  ;;  %vm168_vm3 = vcmp.eq.s32.totalorder %v1307_v58, %v80_v62 }
  0x87   :  { %994 = vmatmul.mubr.msk.f32.vlgmr.msra.gmra.mrb[0].mxu0 %vm166_vm2, %v1138_v61 }
  0x88   :  { %996 = vmatprep.mubr.msk.f32.mxu0 %vm167_vm1, %v1138_v61 }
  0x89   :  { %v86_v0 = vpop.permute.xlu1 %85  ;;  %v83_v1 = vpop.permute.xlu0 %82 }
  0x8a   :  { %vm169_vm4 = vcmp.eq.s32.totalorder %v1307_v58, %v83_v1  ;;  %vm170_vm5 = vcmp.eq.s32.totalorder %v1307_v58, %v86_v0 }
  0x8b   :  { %997 = vmatmul.mubr.msk.f32.gmra.mrb[2].mxu0 %vm168_vm3, %v1138_v61 }
  0x8c   :  { %999 = vmatprep.mubr.msk.f32.mxu0 %vm169_vm4, %v1138_v61 }
  0x8d   :  { %v92_v2 = vpop.permute.xlu1 %91  ;;  %v89_v3 = vpop.permute.xlu0 %88 }
  0x8e   :  { %vm171_vm6 = vcmp.eq.s32.totalorder %v1307_v58, %v89_v3  ;;  %vm172_vm7 = vcmp.eq.s32.totalorder %v1307_v58, %v92_v2 }
  0x8f   :  { %1000 = vmatmul.mubr.msk.f32.gmra.mrb[4].mxu0 %vm170_vm5, %v1138_v61 }
  0x90   :  { %1002 = vmatprep.mubr.msk.f32.mxu0 %vm171_vm6, %v1138_v61 }
  0x91   :  { %v98_v4 = vpop.permute.xlu1 %97  ;;  %v95_v5 = vpop.permute.xlu0 %94 }
  0x92   :  { %vm173_vm8 = vcmp.eq.s32.totalorder %v1307_v58, %v95_v5  ;;  %vm174_vm9 = vcmp.eq.s32.totalorder %v1307_v58, %v98_v4 }
  0x93   :  { %1003 = vmatmul.mubr.msk.f32.gmra.mrb[6].mxu0 %vm172_vm7, %v1138_v61 }
  0x94   :  { %1005 = vmatprep.mubr.msk.f32.mxu0 %vm173_vm8, %v1138_v61 }
  0x95   :  { %v104_v6 = vpop.permute.xlu1 %103  ;;  %v101_v7 = vpop.permute.xlu0 %100 }
  0x96   :  { %vm175_vm10 = vcmp.eq.s32.totalorder %v1307_v58, %v101_v7  ;;  %vm176_vm11 = vcmp.eq.s32.totalorder %v1307_v58, %v104_v6 }
  0x97   :  { %1006 = vmatmul.mubr.msk.f32.gmra.mrb[8].mxu0 %vm174_vm9, %v1138_v61 }
  0x98   :  { %1008 = vmatprep.mubr.msk.f32.mxu0 %vm175_vm10, %v1138_v61 }
  0x99   :  { %v110_v8 = vpop.permute.xlu1 %109  ;;  %v107_v9 = vpop.permute.xlu0 %106 }
  0x9a   :  { %vm177_vm12 = vcmp.eq.s32.totalorder %v1307_v58, %v107_v9  ;;  %vm178_vm13 = vcmp.eq.s32.totalorder %v1307_v58, %v110_v8 }
  0x9b   :  { %1009 = vmatmul.mubr.msk.f32.gmra.mrb[10].mxu0 %vm176_vm11, %v1138_v61 }
  0x9c   :  { %1011 = vmatprep.mubr.msk.f32.mxu0 %vm177_vm12, %v1138_v61 }
  0x9d   :  { %v116_v10 = vpop.permute.xlu1 %115  ;;  %v113_v11 = vpop.permute.xlu0 %112 }
  0x9e   :  { %vm179_vm14 = vcmp.eq.s32.totalorder %v1307_v58, %v113_v11  ;;  %vm180_vm15 = vcmp.eq.s32.totalorder %v1307_v58, %v116_v10 }
  0x9f   :  { %1012 = vmatmul.mubr.msk.f32.gmra.mrb[12].mxu0 %vm178_vm13, %v1138_v61 }
  0xa0   :  { %1014 = vmatprep.mubr.msk.f32.mxu0 %vm179_vm14, %v1138_v61 }
  0xa1   :  { %v122_v12 = vpop.permute.xlu1 %121  ;;  %v119_v13 = vpop.permute.xlu0 %118 }
  0xa2   :  { %vm181_vm0 = vcmp.eq.s32.totalorder %v1307_v58, %v119_v13  ;;  %vm182_vm1 = vcmp.eq.s32.totalorder %v1307_v58, %v122_v12 }
  0xa3   :  { %1015 = vmatmul.mubr.msk.f32.gmra.mrb[14].mxu0 %vm180_vm15, %v1138_v61 }
  0xa4   :  { %1017 = vmatprep.mubr.msk.f32.mxu0 %vm181_vm0, %v1138_v61  ;;  %vm256_vm0 = vcmp.eq.s32.totalorder %v1374_v28, %v1381_v32 }
  0xa5   :  { %v128_v14 = vpop.permute.xlu1 %127  ;;  %v125_v15 = vpop.permute.xlu0 %124  ;;  %801 = vmatprep.mubr.msk.f32.mxu1 %vm256_vm0, %v1138_v61  ;;  %vm285_vm0 = vcmp.eq.s32.totalorder %v1489_v48, %v1383_v33 }
  0xa6   :  { %vm183_vm2 = vcmp.eq.s32.totalorder %v1307_v58, %v125_v15  ;;  %vm184_vm3 = vcmp.eq.s32.totalorder %v1307_v58, %v128_v14 }
  0xa7   :  { %1018 = vmatmul.mubr.msk.f32.gmra.mrb[16].mxu0 %vm182_vm1, %v1138_v61  ;;  %vm255_vm1 = vcmp.eq.s32.totalorder %v1374_v28, %v1383_v33 }
  0xa8   :  { %1020 = vmatprep.mubr.msk.f32.mxu0 %vm183_vm2, %v1138_v61  ;;  %vm258_vm2 = vcmp.eq.s32.totalorder %v1391_v34, %v1381_v32 }
  0xa9   :  { %v134_v16 = vpop.permute.xlu1 %133  ;;  %v131_v17 = vpop.permute.xlu0 %130 }
  0xaa   :  { %vm185_vm4 = vcmp.eq.s32.totalorder %v1307_v58, %v131_v17  ;;  %vm186_vm5 = vcmp.eq.s32.totalorder %v1307_v58, %v134_v16 }
  0xab   :  { %1021 = vmatmul.mubr.msk.f32.gmra.mrb[18].mxu0 %vm184_vm3, %v1138_v61  ;;  %vm257_vm3 = vcmp.eq.s32.totalorder %v1391_v34, %v1383_v33 }
  0xac   :  { %1023 = vmatprep.mubr.msk.f32.mxu0 %vm185_vm4, %v1138_v61  ;;  %vm260_vm4 = vcmp.eq.s32.totalorder %v1398_v35, %v1381_v32 }
  0xad   :  { %v140_v18 = vpop.permute.xlu1 %139  ;;  %v137_v19 = vpop.permute.xlu0 %136 }
  0xae   :  { %vm187_vm6 = vcmp.eq.s32.totalorder %v1307_v58, %v137_v19  ;;  %vm188_vm7 = vcmp.eq.s32.totalorder %v1307_v58, %v140_v18 }
  0xaf   :  { %1024 = vmatmul.mubr.msk.f32.gmra.mrb[20].mxu0 %vm186_vm5, %v1138_v61  ;;  %vm259_vm5 = vcmp.eq.s32.totalorder %v1398_v35, %v1383_v33 }
  0xb0   :  { %1026 = vmatprep.mubr.msk.f32.mxu0 %vm187_vm6, %v1138_v61  ;;  %vm262_vm6 = vcmp.eq.s32.totalorder %v1405_v36, %v1381_v32 }
  0xb1   :  { %v146_v20 = vpop.permute.xlu1 %145  ;;  %v143_v21 = vpop.permute.xlu0 %142 }
  0xb2   :  { %vm189_vm8 = vcmp.eq.s32.totalorder %v1307_v58, %v143_v21  ;;  %vm190_vm9 = vcmp.eq.s32.totalorder %v1307_v58, %v146_v20 }
  0xb3   :  { %1027 = vmatmul.mubr.msk.f32.gmra.mrb[22].mxu0 %vm188_vm7, %v1138_v61  ;;  %vm261_vm7 = vcmp.eq.s32.totalorder %v1405_v36, %v1383_v33 }
  0xb4   :  { %1029 = vmatprep.mubr.msk.f32.mxu0 %vm189_vm8, %v1138_v61  ;;  %vm264_vm8 = vcmp.eq.s32.totalorder %v1412_v37, %v1381_v32 }
  0xb5   :  { %v152_v22 = vpop.permute.xlu1 %151  ;;  %v149_v23 = vpop.permute.xlu0 %148 }
  0xb6   :  { %vm191_vm10 = vcmp.eq.s32.totalorder %v1307_v58, %v149_v23  ;;  %vm192_vm11 = vcmp.eq.s32.totalorder %v1307_v58, %v152_v22 }
  0xb7   :  { %1030 = vmatmul.mubr.msk.f32.gmra.mrb[24].mxu0 %vm190_vm9, %v1138_v61  ;;  %vm263_vm9 = vcmp.eq.s32.totalorder %v1412_v37, %v1383_v33 }
  0xb8   :  { %1032 = vmatprep.mubr.msk.f32.mxu0 %vm191_vm10, %v1138_v61  ;;  %vm266_vm10 = vcmp.eq.s32.totalorder %v1419_v38, %v1381_v32 }
  0xb9   :  { %v158_v24 = vpop.permute.xlu1 %157  ;;  %v155_v25 = vpop.permute.xlu0 %154 }
  0xba   :  { %vm193_vm12 = vcmp.eq.s32.totalorder %v1307_v58, %v155_v25  ;;  %vm194_vm13 = vcmp.eq.s32.totalorder %v1307_v58, %v158_v24 }
  0xbb   :  { %1033 = vmatmul.mubr.msk.f32.gmra.mrb[26].mxu0 %vm192_vm11, %v1138_v61  ;;  %vm265_vm11 = vcmp.eq.s32.totalorder %v1419_v38, %v1383_v33 }
  0xbc   :  { %1035 = vmatprep.mubr.msk.f32.mxu0 %vm193_vm12, %v1138_v61  ;;  %vm281_vm12 = vcmp.eq.s32.totalorder %v1475_v46, %v1383_v33 }
  0xbd   :  { %v161_v26 = vpop.permute.xlu0 %160  ;;  %v164_v27 = vpop.permute.xlu1 %163 }
  0xbe   :  { %vm195_vm14 = vcmp.eq.s32.totalorder %v1307_v58, %v161_v26  ;;  %vm196_vm15 = vcmp.eq.s32.totalorder %v1307_v58, %v164_v27 }
  0xbf   :  { %1036 = vmatmul.mubr.msk.f32.gmra.mrb[28].mxu0 %vm194_vm13, %v1138_v61  ;;  %vm284_vm13 = vcmp.eq.s32.totalorder %v1482_v47, %v1381_v32 }
  0xc0   :  { %1038 = vmatprep.mubr.msk.f32.mxu0 %vm195_vm14, %v1138_v61  ;;  %vm283_vm14 = vcmp.eq.s32.totalorder %v1482_v47, %v1383_v33 }
  0xc3   :  { %1039 = vmatmul.mubr.msk.f32.gmra.mrb[30].mxu0 %vm196_vm15, %v1138_v61  ;;  %vm286_vm15 = vcmp.eq.s32.totalorder %v1489_v48, %v1381_v32 }
 0x15a   :  { %v995_v49 = vpop.f32.mrb[0].mxu0 }
 0x15b   :  { %v401_v50 = vpop.f32.mrb[1].mxu0 }
 0x15c   :  { %v1075_v51 = vpack.c.bf16 %v995_v49, %v401_v50 }
 0x15e   :  { %v998_v52 = vpop.f32.mrb[2].mxu0 }
 0x15f   :  { %v411_v53 = vpop.f32.mrb[3].mxu0 }
 0x160   :  { %v1079_v54 = vpack.c.bf16 %v998_v52, %v411_v53 }
 0x162   :  { %v1001_v55 = vpop.f32.mrb[4].mxu0 }
 0x163   :  { %v421_v56 = vpop.f32.mrb[5].mxu0 }
 0x164   :  { %v1083_v57 = vpack.c.bf16 %v1001_v55, %v421_v56 }
 0x166   :  { %v1004_v58 = vpop.f32.mrb[6].mxu0 }
 0x167   :  { %v431_v59 = vpop.f32.mrb[7].mxu0 }
 0x168   :  { %v1087_v60 = vpack.c.bf16 %v1004_v58, %v431_v59 }
 0x16a   :  { %v1007_v62 = vpop.f32.mrb[8].mxu0 }
 0x16b   :  { %v441_v63 = vpop.f32.mrb[9].mxu0 }
 0x16c   :  { %v1091_v0 = vpack.c.bf16 %v1007_v62, %v441_v63 }
 0x16e   :  { %v1010_v1 = vpop.f32.mrb[10].mxu0 }
 0x16f   :  { %v451_v2 = vpop.f32.mrb[11].mxu0 }
 0x170   :  { %v1095_v3 = vpack.c.bf16 %v1010_v1, %v451_v2 }
 0x172   :  { %v1013_v4 = vpop.f32.mrb[12].mxu0 }
 0x173   :  { %v461_v5 = vpop.f32.mrb[13].mxu0 }
 0x174   :  { %v1099_v6 = vpack.c.bf16 %v1013_v4, %v461_v5 }
 0x176   :  { %v1016_v7 = vpop.f32.mrb[14].mxu0 }
 0x177   :  { %v471_v8 = vpop.f32.mrb[15].mxu0 }
 0x178   :  { %v1103_v9 = vpack.c.bf16 %v1016_v7, %v471_v8 }
 0x17a   :  { %v1019_v10 = vpop.f32.mrb[16].mxu0 }
 0x17b   :  { %v481_v11 = vpop.f32.mrb[17].mxu0 }
 0x17c   :  { %v1073_v12 = vpack.c.bf16 %v1019_v10, %v481_v11 }
 0x17e   :  { %v1022_v13 = vpop.f32.mrb[18].mxu0  ;;  %1074 = vmatprep.subr.bf16.mxu1 %v1073_v12 }
 0x17f   :  { %v491_v14 = vpop.f32.mrb[19].mxu0  ;;  %1076 = vmatpush3.bf16.msra.mxu1 %v1075_v51 }
 0x180   :  { %v1077_v15 = vpack.c.bf16 %v1022_v13, %v491_v14 }
 0x182   :  { %v1025_v16 = vpop.f32.mrb[20].mxu0  ;;  %1078 = vmatprep.subr.bf16.mxu1 %v1077_v15 }
 0x183   :  { %v501_v17 = vpop.f32.mrb[21].mxu0  ;;  %1080 = vmatpush3.bf16.msra.mxu1 %v1079_v54 }
 0x184   :  { %v1081_v18 = vpack.c.bf16 %v1025_v16, %v501_v17 }
 0x186   :  { %v1028_v19 = vpop.f32.mrb[22].mxu0  ;;  %1082 = vmatprep.subr.bf16.mxu1 %v1081_v18 }
 0x187   :  { %v511_v20 = vpop.f32.mrb[23].mxu0  ;;  %1084 = vmatpush3.bf16.msra.mxu1 %v1083_v57 }
 0x188   :  { %v1085_v21 = vpack.c.bf16 %v1028_v19, %v511_v20 }
 0x18a   :  { %v1031_v22 = vpop.f32.mrb[24].mxu0  ;;  %1086 = vmatprep.subr.bf16.mxu1 %v1085_v21 }
 0x18b   :  { %v521_v23 = vpop.f32.mrb[25].mxu0  ;;  %1088 = vmatpush3.bf16.msra.mxu1 %v1087_v60 }
 0x18c   :  { %v1089_v24 = vpack.c.bf16 %v1031_v22, %v521_v23 }
 0x18e   :  { %v1034_v25 = vpop.f32.mrb[26].mxu0  ;;  %1090 = vmatprep.subr.bf16.mxu1 %v1089_v24 }
 0x18f   :  { %v531_v26 = vpop.f32.mrb[27].mxu0  ;;  %1092 = vmatpush3.bf16.msra.mxu1 %v1091_v0 }
 0x190   :  { %v1093_v27 = vpack.c.bf16 %v1034_v25, %v531_v26 }
 0x192   :  { %v1037_v29 = vpop.f32.mrb[28].mxu0  ;;  %1094 = vmatprep.subr.bf16.mxu1 %v1093_v27 }
 0x193   :  { %v541_v30 = vpop.f32.mrb[29].mxu0  ;;  %1096 = vmatpush3.bf16.msra.mxu1 %v1095_v3 }
 0x194   :  { %v1097_v31 = vpack.c.bf16 %v1037_v29, %v541_v30 }
 0x196   :  { %v1040_v49 = vpop.f32.mrb[30].mxu0  ;;  %1098 = vmatprep.subr.bf16.mxu1 %v1097_v31 }
 0x197   :  { %v551_v50 = vpop.f32.mrb[31].mxu0  ;;  %1100 = vmatpush3.bf16.msra.mxu1 %v1099_v6 }
 0x198   :  { %v1101_v51 = vpack.c.bf16 %v1040_v49, %v551_v50 }
 0x19a   :  { %1102 = vmatprep.subr.bf16.mxu1 %v1101_v51 }
 0x19b   :  { %1104 = vmatpush3.bf16.msra.mxu1 %v1103_v9 }
 0x19e   :  { %802 = vmatmul.mubr.msk.f32.vlgmr.msra.gmra.mrb[0].mxu1 %vm255_vm1, %v1138_v61  ;;  %vm1635_vm1 = vcmp.eq.s32.totalorder %v1426_v39, %v1381_v32 }
 0x19f   :  { %803 = vmatprep.mubr.msk.f32.mxu1 %vm258_vm2, %v1138_v61  ;;  %vm1636_vm2 = vcmp.eq.s32.totalorder %v1426_v39, %v1383_v33 }
 0x1a2   :  { %804 = vmatmul.mubr.msk.f32.gmra.mrb[2].mxu1 %vm257_vm3, %v1138_v61  ;;  %vm1637_vm3 = vcmp.eq.s32.totalorder %v1433_v40, %v1381_v32 }
 0x1a3   :  { %805 = vmatprep.mubr.msk.f32.mxu1 %vm260_vm4, %v1138_v61  ;;  %vm1638_vm4 = vcmp.eq.s32.totalorder %v1433_v40, %v1383_v33 }
 0x1a6   :  { %806 = vmatmul.mubr.msk.f32.gmra.mrb[4].mxu1 %vm259_vm5, %v1138_v61  ;;  %vm1639_vm5 = vcmp.eq.s32.totalorder %v1440_v41, %v1381_v32 }
 0x1a7   :  { %807 = vmatprep.mubr.msk.f32.mxu1 %vm262_vm6, %v1138_v61  ;;  %vm1640_vm6 = vcmp.eq.s32.totalorder %v1440_v41, %v1383_v33 }
 0x1aa   :  { %808 = vmatmul.mubr.msk.f32.gmra.mrb[6].mxu1 %vm261_vm7, %v1138_v61  ;;  %vm1641_vm7 = vcmp.eq.s32.totalorder %v1447_v42, %v1381_v32 }
 0x1ab   :  { %809 = vmatprep.mubr.msk.f32.mxu1 %vm264_vm8, %v1138_v61  ;;  %vm1642_vm8 = vcmp.eq.s32.totalorder %v1447_v42, %v1383_v33 }
 0x1ae   :  { %810 = vmatmul.mubr.msk.f32.gmra.mrb[8].mxu1 %vm263_vm9, %v1138_v61  ;;  %vm1643_vm9 = vcmp.eq.s32.totalorder %v1454_v43, %v1381_v32 }
 0x1af   :  { %811 = vmatprep.mubr.msk.f32.mxu1 %vm266_vm10, %v1138_v61  ;;  %vm1644_vm10 = vcmp.eq.s32.totalorder %v1454_v43, %v1383_v33 }
 0x1b2   :  { %812 = vmatmul.mubr.msk.f32.gmra.mrb[10].mxu1 %vm265_vm11, %v1138_v61  ;;  %vm1645_vm11 = vcmp.eq.s32.totalorder %v1461_v44, %v1381_v32 }
 0x1b3   :  { %813 = vmatprep.mubr.msk.f32.mxu1 %vm1635_vm1, %v1138_v61  ;;  %vm1646_vm1 = vcmp.eq.s32.totalorder %v1461_v44, %v1383_v33 }
 0x1b6   :  { %814 = vmatmul.mubr.msk.f32.gmra.mrb[12].mxu1 %vm1636_vm2, %v1138_v61  ;;  %vm1647_vm2 = vcmp.eq.s32.totalorder %v1468_v45, %v1381_v32 }
 0x1b7   :  { %815 = vmatprep.mubr.msk.f32.mxu1 %vm1637_vm3, %v1138_v61  ;;  %vm1648_vm3 = vcmp.eq.s32.totalorder %v1468_v45, %v1383_v33 }
 0x1ba   :  { %816 = vmatmul.mubr.msk.f32.gmra.mrb[14].mxu1 %vm1638_vm4, %v1138_v61  ;;  %vm1649_vm4 = vcmp.eq.s32.totalorder %v1475_v46, %v1381_v32 }
 0x1bb   :  { %817 = vmatprep.mubr.msk.f32.mxu1 %vm1639_vm5, %v1138_v61 }
 0x1be   :  { %818 = vmatmul.mubr.msk.f32.gmra.mrb[16].mxu1 %vm1640_vm6, %v1138_v61 }
 0x1bf   :  { %819 = vmatprep.mubr.msk.f32.mxu1 %vm1641_vm7, %v1138_v61 }
 0x1c2   :  { %820 = vmatmul.mubr.msk.f32.gmra.mrb[18].mxu1 %vm1642_vm8, %v1138_v61 }
 0x1c3   :  { %821 = vmatprep.mubr.msk.f32.mxu1 %vm1643_vm9, %v1138_v61 }
 0x1c6   :  { %822 = vmatmul.mubr.msk.f32.gmra.mrb[20].mxu1 %vm1644_vm10, %v1138_v61 }
 0x1c7   :  { %823 = vmatprep.mubr.msk.f32.mxu1 %vm1645_vm11, %v1138_v61 }
 0x1ca   :  { %824 = vmatmul.mubr.msk.f32.gmra.mrb[22].mxu1 %vm1646_vm1, %v1138_v61 }
 0x1cb   :  { %825 = vmatprep.mubr.msk.f32.mxu1 %vm1647_vm2, %v1138_v61 }
 0x1ce   :  { %826 = vmatmul.mubr.msk.f32.gmra.mrb[24].mxu1 %vm1648_vm3, %v1138_v61 }
 0x1cf   :  { %827 = vmatprep.mubr.msk.f32.mxu1 %vm1649_vm4, %v1138_v61 }
 0x1d2   :  { %828 = vmatmul.mubr.msk.f32.gmra.mrb[26].mxu1 %vm281_vm12, %v1138_v61 }
 0x1d3   :  { %829 = vmatprep.mubr.msk.f32.mxu1 %vm284_vm13, %v1138_v61 }
 0x1d6   :  { %830 = vmatmul.mubr.msk.f32.gmra.mrb[28].mxu1 %vm283_vm14, %v1138_v61 }
 0x1d7   :  { %831 = vmatprep.mubr.msk.f32.mxu1 %vm286_vm15, %v1138_v61 }
 0x1da   :  { %832 = vmatmul.mubr.msk.f32.gmra.mrb[30].mxu1 %vm285_vm0, %v1138_v61 }
 0x271   :  { %v913_v28 = vpop.f32.mrb[0].mxu1 }
 0x272   :  { %v914_v34 = vpop.f32.mrb[1].mxu1 }
 0x273   :  { %v915_v35 = vadd.f32 %v914_v34, %v913_v28 }
 0x275   :  { %v916_v36 = vpop.f32.mrb[2].mxu1  ;;  %737 = vst [vmem:[#allocation2] sm:$0xff] %v915_v35 }
 0x276   :  { %v917_v37 = vpop.f32.mrb[3].mxu1 }
 0x277   :  { %v918_v38 = vadd.f32 %v917_v37, %v916_v36 }
 0x279   :  { %v919_v39 = vpop.f32.mrb[4].mxu1  ;;  %738 = vst [vmem:[#allocation2 + $0x8] sm:$0xff] %v918_v38 }
 0x27a   :  { %v920_v40 = vpop.f32.mrb[5].mxu1 }
 0x27b   :  { %v921_v41 = vadd.f32 %v920_v40, %v919_v39 }
 0x27d   :  { %v922_v42 = vpop.f32.mrb[6].mxu1  ;;  %739 = vst [vmem:[#allocation2 + $0x10] sm:$0xff] %v921_v41 }
 0x27e   :  { %v923_v43 = vpop.f32.mrb[7].mxu1 }
 0x27f   :  { %v924_v32 = vadd.f32 %v923_v43, %v922_v42 }
 0x281   :  { %v925_v44 = vpop.f32.mrb[8].mxu1  ;;  %740 = vst [vmem:[#allocation2 + $0x18] sm:$0xff] %v924_v32 }
 0x282   :  { %v926_v45 = vpop.f32.mrb[9].mxu1 }
 0x283   :  { %v927_v33 = vadd.f32 %v926_v45, %v925_v44 }
 0x285   :  { %v928_v61 = vpop.f32.mrb[10].mxu1  ;;  %741 = vst [vmem:[#allocation2 + $0x20] sm:$0xff] %v927_v33 }
 0x286   :  { %v929_v46 = vpop.f32.mrb[11].mxu1 }
 0x287   :  { %v930_v47 = vadd.f32 %v929_v46, %v928_v61 }
 0x289   :  { %v931_v48 = vpop.f32.mrb[12].mxu1  ;;  %742 = vst [vmem:[#allocation2 + $0x28] sm:$0xff] %v930_v47 }
 0x28a   :  { %v932_v52 = vpop.f32.mrb[13].mxu1 }
 0x28b   :  { %v933_v53 = vadd.f32 %v932_v52, %v931_v48 }
 0x28d   :  { %v934_v54 = vpop.f32.mrb[14].mxu1  ;;  %743 = vst [vmem:[#allocation2 + $0x30] sm:$0xff] %v933_v53 }
 0x28e   :  { %v935_v55 = vpop.f32.mrb[15].mxu1 }
 0x28f   :  { %v936_v56 = vadd.f32 %v935_v55, %v934_v54 }
 0x291   :  { %v937_v57 = vpop.f32.mrb[16].mxu1  ;;  %744 = vst [vmem:[#allocation2 + $0x38] sm:$0xff] %v936_v56 }
 0x292   :  { %v938_v58 = vpop.f32.mrb[17].mxu1 }
 0x293   :  { %v939_v59 = vadd.f32 %v938_v58, %v937_v57 }
 0x295   :  { %v940_v60 = vpop.f32.mrb[18].mxu1  ;;  %745 = vst [vmem:[#allocation2 + $0x40] sm:$0xff] %v939_v59 }
 0x296   :  { %v941_v62 = vpop.f32.mrb[19].mxu1 }
 0x297   :  { %v942_v63 = vadd.f32 %v941_v62, %v940_v60 }
 0x299   :  { %v943_v0 = vpop.f32.mrb[20].mxu1  ;;  %746 = vst [vmem:[#allocation2 + $0x48] sm:$0xff] %v942_v63 }
 0x29a   :  { %v944_v1 = vpop.f32.mrb[21].mxu1 }
 0x29b   :  { %v945_v2 = vadd.f32 %v944_v1, %v943_v0 }
 0x29d   :  { %v946_v3 = vpop.f32.mrb[22].mxu1  ;;  %747 = vst [vmem:[#allocation2 + $0x50] sm:$0xff] %v945_v2 }
 0x29e   :  { %v947_v4 = vpop.f32.mrb[23].mxu1 }
 0x29f   :  { %v948_v5 = vadd.f32 %v947_v4, %v946_v3 }
 0x2a1   :  { %v949_v6 = vpop.f32.mrb[24].mxu1  ;;  %748 = vst [vmem:[#allocation2 + $0x58] sm:$0xff] %v948_v5 }
 0x2a2   :  { %v950_v7 = vpop.f32.mrb[25].mxu1 }
 0x2a3   :  { %v951_v8 = vadd.f32 %v950_v7, %v949_v6 }
 0x2a5   :  { %v952_v9 = vpop.f32.mrb[26].mxu1  ;;  %749 = vst [vmem:[#allocation2 + $0x60] sm:$0xff] %v951_v8 }
 0x2a6   :  { %v953_v10 = vpop.f32.mrb[27].mxu1 }
 0x2a7   :  { %v954_v11 = vadd.f32 %v953_v10, %v952_v9 }
 0x2a9   :  { %v955_v12 = vpop.f32.mrb[28].mxu1  ;;  %750 = vst [vmem:[#allocation2 + $0x68] sm:$0xff] %v954_v11 }
 0x2aa   :  { %v956_v13 = vpop.f32.mrb[29].mxu1 }
 0x2ab   :  { %v957_v14 = vadd.f32 %v956_v13, %v955_v12 }
 0x2ad   :  { %v958_v15 = vpop.f32.mrb[30].mxu1  ;;  %751 = vst [vmem:[#allocation2 + $0x70] sm:$0xff] %v957_v14 }
 0x2ae   :  { %v959_v16 = vpop.f32.mrb[31].mxu1 }
 0x2af   :  { %v960_v17 = vadd.f32 %v959_v16, %v958_v15 }
 0x2b1   :  { %752 = vst [vmem:[#allocation2 + $0x78] sm:$0xff] %v960_v17 }
 0x2b2   :  { %1124 = shalt.err (!%p1121_p4)
}
 0x2b3   :  { %s1125_s4 = scalar_lea.hbm %s1634_s3, 2048 }
 0x2b4   :  { %p1126_p5 = scmp.ne.s32.totalorder %s1634_s3, %s1125_s4  ;;  %p1129_p6 = scmp.lt.u32.totalorder %s1125_s4, %s1634_s3 }
 0x2b6   :  { %p1131_p7 = pnand %p1129_p6, %p1126_p5 }
 0x2b8   :  { %1134 = shalt.err (!%p1131_p7)
}
 0x2b9   :  { %s1140_s8 = smov 128   ;;  %s1141_s9 = smov 8  }
 0x2ba   :  { %764 = dma.vmem_to_hbm [thread:$0]  %s759_s27, 2048, %s1634_s3, [#allocation3], %s1140_s8, %s1140_s8, %s1141_s9  }
 0x2bb   :  { %1135 = dma.done.wait [#allocation3], 2048  }
 0x2bc   :  { %1136 = vsyncadd [#allocation3], 4294965248 }
 0x2bd   :  { %768 = vsyncpa [#allocation3], 1 }

</bundles_post_ra>
